<compile_context>
chip_gen: v5e
topology: v5e:2x2
jax: 0.10.0
libtpu: 0.0.40
codegen_flags: <defaults>
</compile_context>

<pallas_src>
import functools

import jax
import jax.numpy as jnp
import numpy as np
from jax.experimental import pallas as pl
from jax.experimental.pallas import tpu as pltpu


def _tanh_attention_kernel(q_ref, mem_ref, mask_ref, wm_ref, v_ref,
                           out_ref,
                           m_sc, l_sc, acc_sc,
                           *, cq, compute_dtype):
    """Grid = (B, Lq_blocks, Lm_blocks); last axis = online-softmax reduction."""
    ki = pl.program_id(2)

    # ---- init accumulators for this (b, q-tile) ----
    @pl.when(ki == 0)
    def _init():
        m_sc[...] = jnp.full(m_sc.shape, -jnp.inf, jnp.float32)
        l_sc[...] = jnp.zeros(l_sc.shape, jnp.float32)
        acc_sc[...] = jnp.zeros(acc_sc.shape, jnp.float32)

    q = q_ref[0]                       # (tlq, H)    f32, pre-projected outside
    mem = mem_ref[0]                   # (tlm, dmp)  f32, feature axis zero-padded
    mask = mask_ref[0]                 # (1, tlm)    f32, 0.0 == masked / padded

    # Memory projection for this memory tile (MXU, f32 accumulation).
    mk = jnp.dot(mem, wm_ref[...], preferred_element_type=jnp.float32)   # (tlm, H)

    tlq, h = q.shape
    tlm = mem.shape[0]

    # Hoisted casts / broadcast operands (outside the chunk loop).
    q_c = q.astype(compute_dtype)
    mk_c = mk.astype(compute_dtype)
    v_b = v_ref[...].reshape(1, 1, h).astype(compute_dtype)              # (1, 1, H)

    # Additive-attention scores, chunked over query rows so only a small
    # (cq, tlm, H) tanh temporary is ever live (never the full (tlq, tlm, H)).
    chunks = []
    for c in range(tlq // cq):
        qc = q_c[c * cq:(c + 1) * cq, :]                                 # (cq, H)
        t = jnp.tanh(qc[:, None, :] + mk_c[None, :, :])                  # (cq, tlm, H)
        # H-reduction against v, accumulated in f32.
        chunks.append(jnp.sum((t * v_b).astype(jnp.float32), axis=-1))   # (cq, tlm)
    scores = chunks[0] if len(chunks) == 1 else jnp.concatenate(chunks, axis=0)

    neg_inf = jnp.float32(-jnp.inf)
    scores = jnp.where(mask == 0.0, neg_inf, scores)         # broadcasts over tlq

    # ---- online-softmax update ----
    m_prev = m_sc[...]                                       # (tlq, 1)
    m_new = jnp.maximum(m_prev, jnp.max(scores, axis=-1, keepdims=True))
    # Guard (-inf) - (-inf) = NaN when every position seen so far is masked.
    m_safe = jnp.where(m_new == neg_inf, 0.0, m_new)
    alpha = jnp.exp(m_prev - m_safe)                         # (tlq, 1)
    p = jnp.exp(scores - m_safe)                             # (tlq, tlm)
    l_sc[...] = alpha * l_sc[...] + jnp.sum(p, axis=-1, keepdims=True)
    acc_sc[...] = alpha * acc_sc[...] + jnp.dot(
        p, mem, preferred_element_type=jnp.float32)          # (tlq, dmp)
    m_sc[...] = m_new

    # ---- finalize ----
    @pl.when(ki == pl.num_programs(2) - 1)
    def _fin():
        # Exact divide: negligible cost at (tlq, dmp); fully-masked rows yield
        # inf/NaN, matching softmax-of-all(-inf) in the reference.
        out_ref[0] = (acc_sc[...] / l_sc[...]).astype(out_ref.dtype)


def _round_up(x, m):
    return ((x + m - 1) // m) * m


def _pad_to(arr, axis, target):
    pad = target - arr.shape[axis]
    if pad == 0:
        return arr
    widths = [(0, 0)] * arr.ndim
    widths[axis] = (0, pad)
    return jnp.pad(arr, widths)


def tanh_attention(x, memory, wq_t, bq, wm_t, v, memory_mask=None,
                   *, q_tile=128, m_tile=256, compute_dtype=jnp.float32):
    """x: (B, Lq, Din); memory: (B, Lm, Dm); wq_t: (Din, H); bq: (1, H);
    wm_t: (Dm, H); v: (1, H); memory_mask: (B, Lm) float (0.0 == masked) or None.

    compute_dtype: dtype for the tanh / additive-score path. Keep f32 on v5e;
    jnp.bfloat16 is a valid knob on v6e/v7x (score accumulation stays f32)."""
    B, Lq, Din = x.shape
    _, Lm, Dm = memory.shape
    H = wq_t.shape[1]

    x = x.astype(jnp.float32)
    memory = memory.astype(jnp.float32)
    wq_t = wq_t.astype(jnp.float32)
    bq = bq.astype(jnp.float32)
    wm_t = wm_t.astype(jnp.float32)
    v = v.astype(jnp.float32)
    if memory_mask is None:
        memory_mask = jnp.ones((B, Lm), dtype=jnp.float32)
    else:
        memory_mask = memory_mask.astype(jnp.float32)

    # Query projection is O(B*Lq*Din*H) -> do it in XLA, keep the kernel lean.
    q = jnp.einsum('bld,dh->blh', x, wq_t) + bq               # (B, Lq, H)

    # ---- tile sizes & padding ----
    tlq = min(q_tile, _round_up(Lq, 8))
    lq_p = _round_up(Lq, tlq)
    tlm = _round_up(Lm, 8) if Lm <= m_tile else m_tile        # m_tile: mult of 128
    lm_p = _round_up(Lm, tlm)
    dm_p = _round_up(Dm, 128)                                 # lane-dense output

    q_p = _pad_to(q, 1, lq_p)
    mem_p = _pad_to(_pad_to(memory, 2, dm_p), 1, lm_p)
    # Padded memory positions get mask == 0.0 -> -inf score -> ignored.
    mask_p = _pad_to(memory_mask, 1, lm_p)[:, None, :]        # (B, 1, lm_p)
    wm_p = _pad_to(wm_t, 0, dm_p)                             # (dm_p, H)

    n_q = lq_p // tlq
    n_k = lm_p // tlm
    grid = (B, n_q, n_k)

    # Query-row chunk for the in-kernel tanh loop: keep (cq, tlm, H) <= ~2 MiB.
    budget = 2 * 1024 * 1024
    cq = 8
    for cand in (64, 32, 16, 8):
        if tlq % cand == 0 and cand * tlm * H * 4 <= budget:
            cq = cand
            break

    cost = pl.CostEstimate(
        flops=int(2 * B * n_q * lm_p * dm_p * H       # memory projection per q-tile
                  + 3 * B * lq_p * lm_p * H           # add + v-contraction
                  + 2 * B * lq_p * lm_p * dm_p),      # p @ memory
        transcendentals=int(B * lq_p * lm_p * H + 2 * B * lq_p * lm_p),
        bytes_accessed=int(q_p.size * 4 + mem_p.size * 4 + mask_p.size * 4
                           + (dm_p * H + H) * 4 + B * lq_p * dm_p * 4),
    )

    kernel = functools.partial(_tanh_attention_kernel, cq=cq,
                               compute_dtype=compute_dtype)

    out = pl.pallas_call(
        kernel,
        out_shape=jax.ShapeDtypeStruct((B, lq_p, dm_p), jnp.float32),
        grid_spec=pltpu.PrefetchScalarGridSpec(
            num_scalar_prefetch=0,
            grid=grid,
            in_specs=[
                pl.BlockSpec((1, tlq, H), lambda b, qi, ki: (b, qi, 0)),
                pl.BlockSpec((1, tlm, dm_p), lambda b, qi, ki: (b, ki, 0)),
                pl.BlockSpec((1, 1, tlm), lambda b, qi, ki: (b, 0, ki)),
                pl.BlockSpec((dm_p, H), lambda b, qi, ki: (0, 0)),
                pl.BlockSpec((1, H), lambda b, qi, ki: (0, 0)),
            ],
            out_specs=pl.BlockSpec((1, tlq, dm_p), lambda b, qi, ki: (b, qi, 0)),
            scratch_shapes=[
                pltpu.VMEM((tlq, 1), jnp.float32),      # running max
                pltpu.VMEM((tlq, 1), jnp.float32),      # running denominator
                pltpu.VMEM((tlq, dm_p), jnp.float32),   # output accumulator
            ],
        ),
        compiler_params=pltpu.CompilerParams(
            dimension_semantics=("parallel", "parallel", "arbitrary"),
            vmem_limit_bytes=48 * 1024 * 1024,          # v7x-safe (64 MiB physical)
        ),
        cost_estimate=cost,
    )(q_p, mem_p, mask_p, wm_p, v)

    return out[:, :Lq, :Dm]


def tanh_attention_ref(x, memory, wq_t, bq, wm_t, v, memory_mask=None):
    """Pure-JAX reference mirroring the PyTorch forward."""
    item1 = x @ wq_t + bq                                   # (B, Lq, H)
    item2 = memory @ wm_t                                   # (B, Lm, H)
    item = item1[:, :, None, :] + item2[:, None, :, :]      # (B, Lq, Lm, H)
    aw = jnp.einsum('bqmh,h->bqm', jnp.tanh(item), v[0])    # (B, Lq, Lm)
    if memory_mask is not None:
        aw = jnp.where(memory_mask[:, None, :] == 0, -jnp.inf, aw)
    aw = jax.nn.softmax(aw, axis=-1)
    return jnp.einsum('bqm,bmd->bqd', aw, memory)


if __name__ == "__main__":
    # Small shapes consistent with the module.
    B, Lq, Lm = 2, 8, 8
    input_dim, memory_dim, hidden_dim = 16, 16, 32

    key = jax.random.PRNGKey(0)
    k_x, k_m, k_wq, k_bq, k_wm, k_v = jax.random.split(key, 6)

    x = jax.random.normal(k_x, (B, Lq, input_dim), dtype=jnp.float32)
    memory = jax.random.normal(k_m, (B, Lm, memory_dim), dtype=jnp.float32)

    wq_t = 0.1 * jax.random.normal(k_wq, (input_dim, hidden_dim), dtype=jnp.float32)
    bq = 0.1 * jax.random.normal(k_bq, (1, hidden_dim), dtype=jnp.float32)
    wm_t = 0.1 * jax.random.normal(k_wm, (memory_dim, hidden_dim), dtype=jnp.float32)
    v = 0.1 * jax.random.normal(k_v, (1, hidden_dim), dtype=jnp.float32)

    # Mask: last two memory positions masked out for batch 1.
    memory_mask = jnp.ones((B, Lm), dtype=jnp.float32)
    memory_mask = memory_mask.at[1, -2:].set(0.0)

    out = jax.block_until_ready(
        tanh_attention(x, memory, wq_t, bq, wm_t, v, memory_mask))
    ref = tanh_attention_ref(x, memory, wq_t, bq, wm_t, v, memory_mask)
    np.testing.assert_allclose(np.asarray(out), np.asarray(ref), rtol=2e-3, atol=2e-3)

    # Larger, non-tile-aligned shapes: exercises multi-tile online-softmax over
    # memory, query/memory padding, lane-padding of Dm and masked padded rows.
    B2, Lq2, Lm2 = 2, 200, 300
    din2, dm2, h2 = 32, 64, 48
    ks = jax.random.split(jax.random.PRNGKey(1), 7)
    x2 = jax.random.normal(ks[0], (B2, Lq2, din2), dtype=jnp.float32)
    mem2 = jax.random.normal(ks[1], (B2, Lm2, dm2), dtype=jnp.float32)
    wq2 = 0.1 * jax.random.normal(ks[2], (din2, h2), dtype=jnp.float32)
    bq2 = 0.1 * jax.random.normal(ks[3], (1, h2), dtype=jnp.float32)
    wm2 = 0.1 * jax.random.normal(ks[4], (dm2, h2), dtype=jnp.float32)
    v2 = 0.1 * jax.random.normal(ks[5], (1, h2), dtype=jnp.float32)
    mask2 = (jax.random.uniform(ks[6], (B2, Lm2)) > 0.3).astype(jnp.float32)
    mask2 = mask2.at[:, 0].set(1.0)   # keep >= 1 valid position per row

    out2 = jax.block_until_ready(
        tanh_attention(x2, mem2, wq2, bq2, wm2, v2, mask2))
    ref2 = tanh_attention_ref(x2, mem2, wq2, bq2, wm2, v2, mask2)
    np.testing.assert_allclose(np.asarray(out2), np.asarray(ref2),
                               rtol=2e-3, atol=2e-3)

    print("KERNEL_OK")
</pallas_src>

<mosaic_0001>
module attributes {stable_mosaic.version = 11 : i64} {
  func.func @_tanh_attention_kernel(%arg0: i32, %arg1: i32, %arg2: i32, %arg3: memref<1x8x32xf32, #tpu.memory_space<vmem>>, %arg4: memref<1x8x128xf32, #tpu.memory_space<vmem>>, %arg5: memref<1x1x8xf32, #tpu.memory_space<vmem>>, %arg6: memref<128x32xf32, #tpu.memory_space<vmem>>, %arg7: memref<1x32xf32, #tpu.memory_space<vmem>>, %arg8: memref<1x8x128xf32, #tpu.memory_space<vmem>>, %arg9: memref<8x1xf32, #tpu.memory_space<vmem>>, %arg10: memref<8x1xf32, #tpu.memory_space<vmem>>, %arg11: memref<8x128xf32, #tpu.memory_space<vmem>>) attributes {dimension_semantics = [#tpu.dimension_semantics<parallel>, #tpu.dimension_semantics<parallel>, #tpu.dimension_semantics<arbitrary>], iteration_bounds = array<i64: 2, 1, 1>, scalar_prefetch = 0 : i64, scratch_operands = 3 : i64, tpu.core_type = #tpu.core_type<tc>, window_params = [{transform_indices = @transform_0, window_bounds = array<i64: 1, 8, 32>}, {transform_indices = @transform_1, window_bounds = array<i64: 1, 8, 128>}, {transform_indices = @transform_2, window_bounds = array<i64: 1, 1, 8>}, {pipeline_mode = #tpu.pipeline_mode<synchronous>, transform_indices = @transform_3, window_bounds = array<i64: 128, 32>}, {pipeline_mode = #tpu.pipeline_mode<synchronous>, transform_indices = @transform_4, window_bounds = array<i64: 1, 32>}, {transform_indices = @transform_5, window_bounds = array<i64: 1, 8, 128>}]} {
    %c0_i32 = arith.constant 0 : i32
    %0 = arith.cmpi eq, %arg2, %c0_i32 : i32
    %1 = arith.extui %0 : i1 to i32
    %c0_i32_0 = arith.constant 0 : i32
    %2 = arith.cmpi ne, %1, %c0_i32_0 : i32
    scf.if %2 {
      %cst_35 = arith.constant 0xFF800000 : f32
      %57 = vector.broadcast %cst_35 : f32 to vector<8x1xf32>
      %c0_36 = arith.constant 0 : index
      %c0_37 = arith.constant 0 : index
      %58 = vector.load %arg9[%c0_36, %c0_37] : memref<8x1xf32, #tpu.memory_space<vmem>>, vector<8x1xf32>
      tpu.vector_store %arg9[%c0_36, %c0_37], %57 {strides = array<i32>} : memref<8x1xf32, #tpu.memory_space<vmem>>, vector<8x1xf32>,
      %cst_38 = arith.constant 0.000000e+00 : f32
      %59 = vector.broadcast %cst_38 : f32 to vector<8x1xf32>
      %c0_39 = arith.constant 0 : index
      %c0_40 = arith.constant 0 : index
      %60 = vector.load %arg10[%c0_39, %c0_40] : memref<8x1xf32, #tpu.memory_space<vmem>>, vector<8x1xf32>
      tpu.vector_store %arg10[%c0_39, %c0_40], %59 {strides = array<i32>} : memref<8x1xf32, #tpu.memory_space<vmem>>, vector<8x1xf32>,
      %cst_41 = arith.constant 0.000000e+00 : f32
      %61 = vector.broadcast %cst_41 : f32 to vector<8x128xf32>
      %c0_42 = arith.constant 0 : index
      %c0_43 = arith.constant 0 : index
      %62 = vector.load %arg11[%c0_42, %c0_43] : memref<8x128xf32, #tpu.memory_space<vmem>>, vector<8x128xf32>
      tpu.vector_store %arg11[%c0_42, %c0_43], %61 {strides = array<i32>} : memref<8x128xf32, #tpu.memory_space<vmem>>, vector<8x128xf32>,
    } else {
    }
    %c0 = arith.constant 0 : index
    %c0_1 = arith.constant 0 : index
    %c0_2 = arith.constant 0 : index
    %3 = vector.load %arg3[%c0, %c0_1, %c0_2] : memref<1x8x32xf32, #tpu.memory_space<vmem>>, vector<1x8x32xf32>
    %4 = vector.shape_cast %3 : vector<1x8x32xf32> to vector<8x32xf32>
    %c0_3 = arith.constant 0 : index
    %c0_4 = arith.constant 0 : index
    %c0_5 = arith.constant 0 : index
    %5 = vector.load %arg4[%c0_3, %c0_4, %c0_5] : memref<1x8x128xf32, #tpu.memory_space<vmem>>, vector<1x8x128xf32>
    %6 = vector.shape_cast %5 : vector<1x8x128xf32> to vector<8x128xf32>
    %c0_6 = arith.constant 0 : index
    %c0_7 = arith.constant 0 : index
    %c0_8 = arith.constant 0 : index
    %7 = vector.load %arg5[%c0_6, %c0_7, %c0_8] : memref<1x1x8xf32, #tpu.memory_space<vmem>>, vector<1x1x8xf32>
    %8 = vector.shape_cast %7 : vector<1x1x8xf32> to vector<1x8xf32>
    %c0_9 = arith.constant 0 : index
    %c0_10 = arith.constant 0 : index
    %9 = vector.load %arg6[%c0_9, %c0_10] : memref<128x32xf32, #tpu.memory_space<vmem>>, vector<128x32xf32>
    %cst = arith.constant dense<0.000000e+00> : vector<8x32xf32>
    %10 = tpu.matmul %6, %9, %cst {dimension_numbers = #tpu.dot_dimension_numbers<[1], [0], [0], [1], [0, 0, 1, 1], [], []>} : vector<8x128xf32>, vector<128x32xf32>, vector<8x32xf32> -> vector<8x32xf32>
    %c0_11 = arith.constant 0 : index
    %c0_12 = arith.constant 0 : index
    %11 = vector.load %arg7[%c0_11, %c0_12] : memref<1x32xf32, #tpu.memory_space<vmem>>, vector<1x32xf32>
    %12 = vector.shape_cast %11 : vector<1x32xf32> to vector<1x1x32xf32>
    %13 = vector.shape_cast %4 : vector<8x32xf32> to vector<8x1x32xf32>
    %14 = vector.shape_cast %10 : vector<8x32xf32> to vector<1x8x32xf32>
    %15 = vector.broadcast %13 : vector<8x1x32xf32> to vector<8x8x32xf32>
    %16 = vector.broadcast %14 : vector<1x8x32xf32> to vector<8x8x32xf32>
    %17 = arith.addf %15, %16 : vector<8x8x32xf32>
    %18 = math.tanh %17 : vector<8x8x32xf32>
    %19 = vector.broadcast %12 : vector<1x1x32xf32> to vector<8x8x32xf32>
    %20 = arith.mulf %18, %19 : vector<8x8x32xf32>
    %cst_13 = arith.constant dense<0.000000e+00> : vector<8x8xf32>
    %21 = vector.multi_reduction <add>, %20, %cst_13 [2] : vector<8x8x32xf32> to vector<8x8xf32>
    %cst_14 = arith.constant 0.000000e+00 : f32
    %22 = vector.broadcast %cst_14 : f32 to vector<1x8xf32>
    %23 = arith.cmpf oeq, %8, %22 : vector<1x8xf32>
    %cst_15 = arith.constant 0xFF800000 : f32
    %24 = vector.shape_cast %23 : vector<1x8xi1> to vector<1x8xi1>
    %25 = vector.broadcast %24 : vector<1x8xi1> to vector<8x8xi1>
    %26 = vector.broadcast %cst_15 : f32 to vector<8x8xf32>
    %27 = arith.select %25, %26, %21 : vector<8x8xi1>, vector<8x8xf32>
    %c0_16 = arith.constant 0 : index
    %c0_17 = arith.constant 0 : index
    %28 = vector.load %arg9[%c0_16, %c0_17] : memref<8x1xf32, #tpu.memory_space<vmem>>, vector<8x1xf32>
    %cst_18 = arith.constant dense<0xFF800000> : vector<8xf32>
    %29 = vector.multi_reduction <maximumf>, %27, %cst_18 [1] : vector<8x8xf32> to vector<8xf32>
    %30 = vector.shape_cast %29 : vector<8xf32> to vector<8x1xf32>
    %31 = arith.maximumf %28, %30 : vector<8x1xf32>
    %cst_19 = arith.constant 0xFF800000 : f32
    %32 = vector.broadcast %cst_19 : f32 to vector<8x1xf32>
    %33 = arith.cmpf oeq, %31, %32 : vector<8x1xf32>
    %cst_20 = arith.constant 0.000000e+00 : f32
    %34 = vector.broadcast %cst_20 : f32 to vector<8x1xf32>
    %35 = arith.select %33, %34, %31 : vector<8x1xi1>, vector<8x1xf32>
    %36 = arith.subf %28, %35 : vector<8x1xf32>
    %37 = math.exp %36 : vector<8x1xf32>
    %38 = vector.broadcast %35 : vector<8x1xf32> to vector<8x8xf32>
    %39 = arith.subf %27, %38 : vector<8x8xf32>
    %40 = math.exp %39 : vector<8x8xf32>
    %c0_21 = arith.constant 0 : index
    %c0_22 = arith.constant 0 : index
    %41 = vector.load %arg10[%c0_21, %c0_22] : memref<8x1xf32, #tpu.memory_space<vmem>>, vector<8x1xf32>
    %42 = arith.mulf %37, %41 : vector<8x1xf32>
    %cst_23 = arith.constant dense<0.000000e+00> : vector<8xf32>
    %43 = vector.multi_reduction <add>, %40, %cst_23 [1] : vector<8x8xf32> to vector<8xf32>
    %44 = vector.shape_cast %43 : vector<8xf32> to vector<8x1xf32>
    %45 = arith.addf %42, %44 : vector<8x1xf32>
    %c0_24 = arith.constant 0 : index
    %c0_25 = arith.constant 0 : index
    %46 = vector.load %arg10[%c0_24, %c0_25] : memref<8x1xf32, #tpu.memory_space<vmem>>, vector<8x1xf32>
    tpu.vector_store %arg10[%c0_24, %c0_25], %45 {strides = array<i32>} : memref<8x1xf32, #tpu.memory_space<vmem>>, vector<8x1xf32>,
    %c0_26 = arith.constant 0 : index
    %c0_27 = arith.constant 0 : index
    %47 = vector.load %arg11[%c0_26, %c0_27] : memref<8x128xf32, #tpu.memory_space<vmem>>, vector<8x128xf32>
    %48 = vector.broadcast %37 : vector<8x1xf32> to vector<8x128xf32>
    %49 = arith.mulf %48, %47 : vector<8x128xf32>
    %cst_28 = arith.constant dense<0.000000e+00> : vector<8x128xf32>
    %50 = tpu.matmul %40, %6, %cst_28 {dimension_numbers = #tpu.dot_dimension_numbers<[1], [0], [0], [1], [0, 0, 1, 1], [], []>} : vector<8x8xf32>, vector<8x128xf32>, vector<8x128xf32> -> vector<8x128xf32>
    %51 = arith.addf %49, %50 : vector<8x128xf32>
    %c0_29 = arith.constant 0 : index
    %c0_30 = arith.constant 0 : index
    %52 = vector.load %arg11[%c0_29, %c0_30] : memref<8x128xf32, #tpu.memory_space<vmem>>, vector<8x128xf32>
    tpu.vector_store %arg11[%c0_29, %c0_30], %51 {strides = array<i32>} : memref<8x128xf32, #tpu.memory_space<vmem>>, vector<8x128xf32>,
    %c0_31 = arith.constant 0 : index
    %c0_32 = arith.constant 0 : index
    %53 = vector.load %arg9[%c0_31, %c0_32] : memref<8x1xf32, #tpu.memory_space<vmem>>, vector<8x1xf32>
    tpu.vector_store %arg9[%c0_31, %c0_32], %31 {strides = array<i32>} : memref<8x1xf32, #tpu.memory_space<vmem>>, vector<8x1xf32>,
    %c0_i32_33 = arith.constant 0 : i32
    %54 = arith.cmpi eq, %arg2, %c0_i32_33 : i32
    %55 = arith.extui %54 : i1 to i32
    %c0_i32_34 = arith.constant 0 : i32
    %56 = arith.cmpi ne, %55, %c0_i32_34 : i32
    scf.if %56 {
      %c0_35 = arith.constant 0 : index
      %c0_36 = arith.constant 0 : index
      %57 = vector.load %arg11[%c0_35, %c0_36] : memref<8x128xf32, #tpu.memory_space<vmem>>, vector<8x128xf32>
      %c0_37 = arith.constant 0 : index
      %c0_38 = arith.constant 0 : index
      %58 = vector.load %arg10[%c0_37, %c0_38] : memref<8x1xf32, #tpu.memory_space<vmem>>, vector<8x1xf32>
      %59 = vector.broadcast %58 : vector<8x1xf32> to vector<8x128xf32>
      %60 = arith.divf %57, %59 : vector<8x128xf32>
      %c0_39 = arith.constant 0 : index
      %c0_40 = arith.constant 0 : index
      %c0_41 = arith.constant 0 : index
      %61 = vector.load %arg8[%c0_39, %c0_40, %c0_41] : memref<1x8x128xf32, #tpu.memory_space<vmem>>, vector<1x8x128xf32>
      %62 = vector.shape_cast %61 : vector<1x8x128xf32> to vector<8x128xf32>
      %63 = vector.shape_cast %60 : vector<8x128xf32> to vector<1x8x128xf32>
      tpu.vector_store %arg8[%c0_39, %c0_40, %c0_41], %63 {strides = array<i32>} : memref<1x8x128xf32, #tpu.memory_space<vmem>>, vector<1x8x128xf32>,
    } else {
    }
    return
  }
  func.func @transform_0(%arg0: i32, %arg1: i32, %arg2: i32) -> (i32, i32, i32) {
    %c0_i32 = arith.constant 0 : i32
    %c0_i32_0 = arith.constant 0 : i32
    return %arg0, %arg1, %c0_i32 : i32, i32, i32
  }
  func.func @transform_1(%arg0: i32, %arg1: i32, %arg2: i32) -> (i32, i32, i32) {
    %c0_i32 = arith.constant 0 : i32
    %c0_i32_0 = arith.constant 0 : i32
    return %arg0, %arg2, %c0_i32 : i32, i32, i32
  }
  func.func @transform_2(%arg0: i32, %arg1: i32, %arg2: i32) -> (i32, i32, i32) {
    %c0_i32 = arith.constant 0 : i32
    %c0_i32_0 = arith.constant 0 : i32
    return %arg0, %c0_i32, %arg2 : i32, i32, i32
  }
  func.func @transform_3(%arg0: i32, %arg1: i32, %arg2: i32) -> (i32, i32) {
    %c0_i32 = arith.constant 0 : i32
    %c0_i32_0 = arith.constant 0 : i32
    %c0_i32_1 = arith.constant 0 : i32
    return %c0_i32, %c0_i32_0 : i32, i32
  }
  func.func @transform_4(%arg0: i32, %arg1: i32, %arg2: i32) -> (i32, i32) {
    %c0_i32 = arith.constant 0 : i32
    %c0_i32_0 = arith.constant 0 : i32
    %c0_i32_1 = arith.constant 0 : i32
    return %c0_i32, %c0_i32_0 : i32, i32
  }
  func.func @transform_5(%arg0: i32, %arg1: i32, %arg2: i32) -> (i32, i32, i32) {
    %c0_i32 = arith.constant 0 : i32
    %c0_i32_0 = arith.constant 0 : i32
    return %arg0, %arg1, %c0_i32 : i32, i32, i32
  }
}

</mosaic_0001>

<bundles_post_ra>
// kernel: tpu_custom_call.1
= control target key start
LH: loop header
LB: loop body
LE: loop exit
PB: predicated region body
PF: predicated region fallthrough
CT: control target
= control target key end

     0   :  { %10 = vsyncpa [#allocation6], 0  ;;  %s1058_s0 = inlined_call_operand.vmem [shape: f32[2,8,32], index: 0, kind: input, shape index: {}]   ;;  %s1059_s1 = inlined_call_operand.vmem [shape: f32[2,8,128], index: 1, kind: input, shape index: {}]   ;;  %s1060_s2 = inlined_call_operand.vmem [shape: f32[2,1,8], index: 2, kind: input, shape index: {}]   ;;  %s1061_s3 = inlined_call_operand.vmem [shape: f32[128,32], index: 3, kind: input, shape index: {}]   ;;  %s1062_s4 = inlined_call_operand.vmem [shape: f32[1,32], index: 4, kind: input, shape index: {}]   ;;  %s1063_s5 = inlined_call_operand.hbm [shape: f32[2,8,128], index: 5, kind: output, shape index: {}]  }
   0x1   :  { %12 = vsyncpa [#allocation6 + $0x1], 0  ;;  %s881_s18 = smov 0   ;;  %s883_s19 = smov 0  }
   0x2   :  { %s885_s20 = smov 0   ;;  %s887_s21 = smov 0  }
   0x3   :  { %s889_s22 = smov 0   ;;  %s891_s23 = smov 0  }
   0x4 LB: > { %s671_s24 = sadd.s32 4294967295, %s846_s23   ;;  %s672_s25 = sadd.s32 4294967294, %s846_s23   ;;  %s846_s23 = sphi %s891_s23, %s18_s23   ;;  %s842_s22 = sphi %s889_s22, %s1070_s22   ;;  %s838_s21 = sphi %s887_s21, %s1069_s21   ;;  %s834_s20 = sphi %s885_s20, %s1068_s20   ;;  %s830_s19 = sphi %s883_s19, %s1067_s19   ;;  %s826_s18 = sphi %s881_s18, %s1066_s18  }
   0x5   : > { %s37_s26 = sadd.s32 1, %s842_s22  ;;  %s172_s27 = sadd.s32 1, %s834_s20 }
   0x6   : > { %p39_p0 = scmp.ge.s32.totalorder %s37_s26, 2  ;;  %p182_p1 = scmp.ne.s32.totalorder %s834_s20, %s830_s19 }
   0x7   : > { %p183_p2 = scmp.eq.s32.totalorder %s671_s24, 1  ;;  %p188_p3 = scmp.ne.s32.totalorder %s830_s19, %s826_s18 }
   0x8   : > { %s1072_s26 = smov (%p39_p0, %s37_s26), 0  ;;  %p189_p5 = scmp.eq.s32.totalorder %s672_s25, 1 }
   0x9   : > { %p921_p4 = por %p183_p2, %p182_p1  ;;  %s167_s29 = ssub.s32 %s842_s22, %s1072_s26 }
   0xa   : > { %p675_p6 = scmp.ge.s32.totalorder %s846_s23, 1  ;;  %p170_p7 = scmp.eq.s32.totalorder %s167_s29, 0 }
   0xb   : > { %p928_p8 = por %p189_p5, %p188_p3  ;;  %p242_p9 = scmp.lt.s32.totalorder %s846_s23, 3 }
   0xc   : > { %s934_s6 = scalar_select %p170_p7, %s834_s20, %s172_s27  }
   0xd   : > { %p243_p10 = pnand %p675_p6, %p242_p9 }
   0xe   : > { %p285_p11 = scmp.lt.s32.totalorder (!%p243_p10), %s838_s21, 1  ;;  %s681_s11 = sshll.u32 (!%p243_p10), %s838_s21, 3 }
   0xf   : > { %246 = sbr.rel (%p243_p10) target bundleno = 815 (0x32f), region = 40  ;;  %s565_s15 = scalar_lea.hbm (!%p243_p10), %s1063_s5, %s681_s11 }
  0x10   : > { %s788_s8 = scalar_lea.hbm (!%p243_p10), %s1063_s5, 16 }
  0x14   : > { %v331_v0 = vld [vmem:[%s1061_s3 + $0x78] sm:$0xff]  ;;  %v330_v1 = vld [vmem:[%s1061_s3 + $0x70] sm:$0xff]  ;;  %v329_v2 = vld [vmem:[%s1061_s3 + $0x68] sm:$0xff]  ;;  %s947_s13 = scalar_select %p285_p11, %s838_s21, 1  ;;  %vm404_vm0 = vcmask 261120   ;;  %vm309_vm1 = vcmask 7168  }
  0x15   : > { %332 = vmatpush.msra.mxu0 %v331_v0  ;;  %v328_v3 = vld [vmem:[%s1061_s3 + $0x60] sm:$0xff]  ;;  %v327_v4 = vld [vmem:[%s1061_s3 + $0x58] sm:$0xff]  ;;  %v326_v6 = vld [vmem:[%s1061_s3 + $0x50] sm:$0xff]  ;;  %vm451_vm2 = vcmask 1041409   ;;  %vm453_vm3 = vcmask 1042434   ;;  %vm455_vm5 = vcmask 1043459  }
  0x16   : > { %s677_s16 = sshll.u32 %s947_s13, 3  ;;  %v325_v7 = vld [vmem:[%s1061_s3 + $0x48] sm:$0xff]  ;;  %v324_v8 = vld [vmem:[%s1061_s3 + $0x40] sm:$0xff]  ;;  %v323_v9 = vld [vmem:[%s1061_s3 + $0x38] sm:$0xff]  ;;  %s304_s9 = scalar_lea.vmem %s1060_s2, %s947_s13  ;;  %vm457_vm6 = vcmask 1044484   ;;  %vm459_vm7 = vcmask 1045509  }
  0x17   : > { %333 = vmatpush.msra.mxu0 %v330_v1  ;;  %s298_s25 = scalar_lea.vmem %s1059_s1, %s677_s16  ;;  %v322_v10 = vld [vmem:[%s1061_s3 + $0x30] sm:$0xff]  ;;  %v321_v11 = vld [vmem:[%s1061_s3 + $0x28] sm:$0xff]  ;;  %v320_v12 = vld [vmem:[%s1061_s3 + $0x20] sm:$0xff]  ;;  %s291_s27 = scalar_lea.vmem %s1058_s0, %s677_s16  ;;  %vm461_vm8 = vcmask 1046534   ;;  %vm463_vm9 = vcmask 1047559   ;;  %vm468_vm11 = vcmask 64512  }
  0x18   : > { %v314_v5 = vld [vmem:[%s298_s25] sm:$0xff]  ;;  %v319_v13 = vld [vmem:[%s1061_s3 + $0x18] sm:$0xff]  ;;  %v318_v14 = vld [vmem:[%s1061_s3 + $0x10] sm:$0xff]  ;;  %s282_s13 = sand.u32 1, %s830_s19   ;;  %s569_s25 = sshll.u32 %s565_s15, 4  ;;  %s570_s25 = int_to_ptr.hbm [resolvable:$true] %s569_s25 }
  0x19   : > { %334 = vmatpush.msra.mxu0 %v329_v2  ;;  %519 = vmatpush.msra.mxu1 %v314_v5  ;;  %v317_v15 = vld [vmem:[%s1061_s3 + $0x8] sm:$0xff]  ;;  %v316_v16 = vld [vmem:[%s1061_s3] sm:$0xff]  ;;  %s676_s10 = sshll.u32 %s282_s13, 3  ;;  %s554_s21 = scalar_lea.sflag [#allocation6], %s282_s13 }
  0x1a   : > { %v313_v17 = vld [vmem:[%s291_s27] sm:$0xff]  ;;  %s284_s17 = scalar_lea.vmem [#allocation5], %s676_s10  ;;  %s782_s27 = sshra.s32 %s570_s25, 4  ;;  %s783_s27 = int_to_ptr.hbm [resolvable:$true] %s782_s27 }
  0x1b   : > { %335 = vmatpush.msra.mxu0 %v328_v3  ;;  %v357_v18 = vrot.slane %v313_v17, 4  ;;  %v355_v19 = vrot.slane %v313_v17, 2  ;;  %v358_v20 = vrot.slane %v313_v17, 5  ;;  %v354_v21 = vrot.slane %v313_v17, 1  ;;  %v745_v38 = vld [vmem:[%s1062_s4] ss:$0 sm:$0xff]  ;;  %p789_p1 = scmp.lt.s32.totalorder %s783_s27, %s1063_s5 }
  0x1c   : > { %v361_v22 = vperm.slane %v313_v17, 0  ;;  %v356_v25 = vrot.slane %v313_v17, 3  ;;  %v359_v34 = vrot.slane %v313_v17, 6  ;;  %v360_v37 = vrot.slane %v313_v17, 7  ;;  %s567_s24 = sshll.u32 %s284_s17, 4  ;;  %s784_s16 = scalar_lea.hbm %s783_s27, 8  ;;  %s568_s24 = int_to_ptr.vmem [resolvable:$true] %s567_s24 }
  0x1d   : > { %336 = vmatpush.msra.mxu0 %v327_v4  ;;  %v365_v23 = vperm.slane %v357_v18, 0  ;;  %v363_v24 = vperm.slane %v355_v19, 0  ;;  %v366_v26 = vperm.slane %v358_v20, 0  ;;  %v362_v28 = vperm.slane %v354_v21, 0  ;;  %p785_p12 = scmp.ne.s32.totalorder %s783_s27, %s784_s16  ;;  %p790_p2 = scmp.lt.s32.totalorder %s788_s8, %s784_s16 }
  0x1e   : > { %v364_v32 = vperm.slane %v356_v25, 0  ;;  %v367_v39 = vperm.slane %v359_v34, 0  ;;  %v368_v41 = vperm.slane %v360_v37, 0  ;;  %v848_v3 = vmov 0  }
  0x1f   : > { %337 = vmatpush.msra.mxu0 %v326_v6  ;;  %742 = vset.pattern.permute.xlu0 %v848_v3  ;;  %v849_v4 = vmov -inf   ;;  %v441_v6 = vlaneseq  ;;  %p786_p13 = pnand %p785_p12, %p921_p4  ;;  %p791_p3 = por %p790_p2, %p789_p1 }
  0x20   : > { %744 = vset.pattern.permute.xlu1 %v848_v3  ;;  %743 = vset.pattern.permute.xlu2 %v848_v3  ;;  %310 = vst.msk [vmem:[#allocation2] sm:$0xff] %vm309_vm1, %v849_v4 }
  0x21   : > { %338 = vmatpush.msra.mxu0 %v325_v7  ;;  %p787_p0 = pneg %p786_p13 }
  0x23   : > { %339 = vmatpush.msra.mxu0 %v324_v8  ;;  %p792_p5 = pnand %p791_p3, %p787_p0 }
  0x25   : > { %340 = vmatpush.msra.mxu0 %v323_v9  ;;  %v442_v9 = vand.u32 127, %v441_v6 }
  0x27   : > { %341 = vmatpush.msra.mxu0 %v322_v10  ;;  %v315_v10 = vld [vmem:[%s304_s9] sm:$0x1] }
  0x28   : > { %vm429_vm4 = vcmp.eq.f32.partialorder %v315_v10, 0.0 }
  0x29   : > { %342 = vmatpush.msra.mxu0 %v321_v11  ;;  %v430_v19 = vsel %vm429_vm4, 1, %v848_v3 }
  0x2b   : > { %343 = vmatpush.msra.mxu0 %v320_v12 }
  0x2d   : > { %344 = vmatpush.msra.mxu0 %v319_v13 }
  0x2f   : > { %345 = vmatpush.msra.mxu0 %v318_v14 }
  0x31   : > { %346 = vmatpush.msra.mxu0 %v317_v15 }
  0x33   : > { %347 = vmatpush.msra.mxu0 %v316_v16 }
  0x34   : > { %348 = vmatmul.f32.vlgmr.msra.gmra.mxu0 %v314_v5 }
  0xb1   : > { %v349_v27 = vpop.f32.mrf.mxu0 }
  0xb2   : > { %v377_v29 = vadd.f32 %v361_v22, %v349_v27  ;;  %v381_v30 = vadd.f32 %v365_v23, %v349_v27  ;;  %v379_v31 = vadd.f32 %v363_v24, %v349_v27  ;;  %v382_v33 = vadd.f32 %v366_v26, %v349_v27 }
  0xb3   : > { %v378_v35 = vadd.f32 %v362_v28, %v349_v27  ;;  %v380_v36 = vadd.f32 %v364_v32, %v349_v27  ;;  %v383_v46 = vadd.f32 %v367_v39, %v349_v27  ;;  %v384_v51 = vadd.f32 %v368_v41, %v349_v27 }
  0xb4   : > { %746 = vtanh.f32 %v377_v29  ;;  %v431_v23 = vperm.slane %v430_v19, 0 }
  0xb5   : > { %748 = vtanh.f32 %v381_v30 }
  0xb6   : > { %750 = vtanh.f32 %v379_v31  ;;  %vm432_vm10 = vcmp.eq.s32.totalorder %v431_v23, 1 }
  0xb7   : > { %752 = vtanh.f32 %v382_v33 }
  0xb8   : > { %754 = vtanh.f32 %v378_v35  ;;  %v850_v35 = vmov 0.0  }
  0xb9   : > { %756 = vtanh.f32 %v380_v36  ;;  %311 = vst.msk [vmem:[#allocation3] sm:$0xff] %vm309_vm1, %v850_v35  ;;  %v467_v36 = vld [vmem:[#allocation2] sm:$0xff] }
  0xba   : > { %v747_v40 = vpop.eup %746  ;;  %758 = vtanh.f32 %v383_v46 }
  0xbb   : > { %v749_v42 = vpop.eup %748  ;;  %v396_v43 = vmul.f32 %v747_v40, %v745_v38  ;;  %760 = vtanh.f32 %v384_v51 }
  0xbc   : > { %v751_v44 = vpop.eup %750  ;;  %v400_v45 = vmul.f32 %v749_v42, %v745_v38 }
  0xbd   : > { %v405_v47 = vsel %vm404_vm0, %v396_v43, 0.0  ;;  %v398_v48 = vmul.f32 %v751_v44, %v745_v38  ;;  %v753_v49 = vpop.eup %752 }
  0xbe   : > { %406 = vadd.xlane.f32.xlu0 %v405_v47  ;;  %v417_v50 = vsel %vm404_vm0, %v400_v45, 0.0  ;;  %v755_v52 = vpop.eup %754  ;;  %v401_v56 = vmul.f32 %v753_v49, %v745_v38 }
  0xbf   : > { %418 = vadd.xlane.f32.xlu2 %v417_v50  ;;  %v411_v53 = vsel %vm404_vm0, %v398_v48, 0.0  ;;  %v757_v54 = vpop.eup %756  ;;  %v397_v55 = vmul.f32 %v755_v52, %v745_v38 }
  0xc0   : > { %412 = vadd.xlane.f32.xlu1 %v411_v53  ;;  %v399_v57 = vmul.f32 %v757_v54, %v745_v38  ;;  %v759_v59 = vpop.eup %758  ;;  %v420_v60 = vsel %vm404_vm0, %v401_v56, 0.0  ;;  %v486_v48 = vld [vmem:[#allocation3] sm:$0xff] }
  0xc1   : > { %v408_v58 = vsel %vm404_vm0, %v397_v55, 0.0  ;;  %v761_v62 = vpop.eup %760  ;;  %v402_v63 = vmul.f32 %v759_v59, %v745_v38 }
  0xc2   : > { %v414_v61 = vsel %vm404_vm0, %v399_v57, 0.0  ;;  %v403_v0 = vmul.f32 %v761_v62, %v745_v38 }
  0xc3   : > { %v423_v1 = vsel %vm404_vm0, %v402_v63, 0.0 }
  0xc4   : > { %v426_v2 = vsel %vm404_vm0, %v403_v0, 0.0 }
  0xc6   : > { %409 = vadd.xlane.f32.xlu0 %v408_v58 }
  0xc7   : > { %421 = vadd.xlane.f32.xlu2 %v420_v60 }
  0xc8   : > { %415 = vadd.xlane.f32.xlu1 %v414_v61 }
  0xce   : > { %424 = vadd.xlane.f32.xlu0 %v423_v1 }
  0xd0   : > { %427 = vadd.xlane.f32.xlu1 %v426_v2 }
 0x131   : > { %v407_v5 = vpop.xlane.xlu0 %406 }
 0x132   : > { %v419_v8 = vpop.xlane.xlu2 %418  ;;  %v443_v12 = vperm.slane %v407_v5, %v442_v9 }
 0x133   : > { %v413_v7 = vpop.xlane.xlu1 %412  ;;  %v447_v20 = vperm.slane %v419_v8, %v442_v9 }
 0x134   : > { %v445_v14 = vperm.slane %v413_v7, %v442_v9 }
 0x139   : > { %v410_v11 = vpop.xlane.xlu0 %409 }
 0x13a   : > { %v444_v13 = vperm.slane %v410_v11, %v442_v9  ;;  %v422_v21 = vpop.xlane.xlu2 %421 }
 0x13b   : > { %v416_v15 = vpop.xlane.xlu1 %415  ;;  %v448_v25 = vperm.slane %v422_v21, %v442_v9 }
 0x13c   : > { %v446_v16 = vperm.slane %v416_v15, %v442_v9  ;;  %v452_v17 = vsel %vm451_vm2, %v444_v13, %v443_v12 }
 0x13d   : > { %v454_v18 = vsel %vm453_vm3, %v445_v14, %v452_v17 }
 0x13e   : > { %v456_v22 = vsel %vm455_vm5, %v446_v16, %v454_v18 }
 0x13f   : > { %v458_v24 = vsel %vm457_vm6, %v447_v20, %v456_v22 }
 0x140   : > { %v460_v29 = vsel %vm459_vm7, %v448_v25, %v458_v24 }
 0x141   : > { %v425_v26 = vpop.xlane.xlu0 %424 }
 0x142   : > { %v449_v27 = vperm.slane %v425_v26, %v442_v9 }
 0x143   : > { %v428_v28 = vpop.xlane.xlu1 %427 }
 0x144   : > { %v450_v30 = vperm.slane %v428_v28, %v442_v9  ;;  %v462_v31 = vsel %vm461_vm8, %v449_v27, %v460_v29 }
 0x146   : > { %v464_v32 = vsel %vm463_vm9, %v450_v30, %v462_v31 }
 0x147   : > { %v466_v33 = vsel %vm432_vm10, -inf, %v464_v32 }
 0x148   : > { %v469_v34 = vsel %vm468_vm11, %v466_v33, -inf }
 0x149   : > { %470 = vmax.xlane.f32.xlu2 %v469_v34 }
 0x1bc   : > { %v471_v37 = vpop.xlane.xlu2 %470 }
 0x1bd   : > { %v472_v38 = vmax.f32 %v467_v36, %v471_v37 }
 0x1bf   : > { %526 = vst.msk [vmem:[#allocation2] sm:$0xff] %vm309_vm1, %v472_v38  ;;  %vm473_vm12 = vcmp.eq.f32.partialorder %v472_v38, -inf }
 0x1c0   : > { %v474_v39 = vsel %vm473_vm12, 0.0, %v472_v38 }
 0x1c1   : > { %480 = vperm.xlu0 %742, %v474_v39   ;;  %v475_v40 = vsub.f32 %v467_v36, %v474_v39 }
 0x1c3   : > { %v476_v46 = vmul.f32 1.442695, %v475_v40 }
 0x233   : > { %v481_v41 = vpop.permute.xlu0 %480 }
 0x234   : > { %v483_v42 = vsub.f32 %v466_v33, %v481_v41 }
 0x236   : > { %v484_v43 = vmul.f32 1.442695, %v483_v42 }
 0x238   : > { %762 = vpow2.f32 %v484_v43 }
 0x239   : > { %764 = vpow2.f32 %v476_v46 }
 0x23e   : > { %v763_v44 = vpop.eup %762 }
 0x23f   : > { %679 = vmatmul.msk.f32.vlgmr.msra.gmra.mxu1 %vm468_vm11, %v763_v44  ;;  %v488_v45 = vsel %vm468_vm11, %v763_v44, 0.0  ;;  %v765_v47 = vpop.eup %764 }
 0x240   : > { %489 = vadd.xlane.f32.xlu1 %v488_v45  ;;  %v487_v49 = vmul.f32 %v765_v47, %v486_v48 }
 0x259   : > { %497 = vperm.xlu1 %744, %v765_v47  }
 0x2b3   : > { %v490_v50 = vpop.xlane.xlu1 %489 }
 0x2b4   : > { %v491_v51 = vadd.f32 %v490_v50, %v487_v49 }
 0x2b6   : > { %493 = vst.msk [vmem:[#allocation3] sm:$0xff] %vm309_vm1, %v491_v51 }
 0x2bc   : > { %v521_v63 = vpop.f32.mrf.mxu1 }
 0x2bd   : > { %v531_v52 = vld [vmem:[#allocation3] sm:$0xff] }
 0x2be   : > { %534 = vperm.xlu2 %743, %v531_v52  }
 0x2cb   : > { %v498_v56 = vpop.permute.xlu1 %497 }
 0x2cc   : > { %v500_v59 = vmul.f32 0.0, %v498_v56 }
 0x2ce   : > { %v524_v1 = vadd.f32 %v521_v63, %v500_v59 }
 0x318   : > { %v535_v53 = vpop.permute.xlu2 %534 }
 0x319   : > { %766 = vrcp.f32 %v535_v53  ;;  %v548_v58 = vand.u32 2147483648, %v535_v53  ;;  %v546_v61 = vand.u32 2147483647, %v535_v53  ;;  %vm542_vm14 = vweird.f32 %v535_v53 }
 0x31b   : > { %v549_v0 = vor.u32 1.1754944e-38, %v548_v58  ;;  %vm547_vm0 = vcmp.eq.f32.partialorder %v546_v61, 8.507059e+37 }
 0x31f   : > { %v767_v54 = vpop.eup %766 }
 0x320   : > { %v538_v55 = vmul.f32 %v767_v54, %v535_v53  ;;  %vm543_vm13 = vweird.f32 %v767_v54 }
 0x321   : > { %vm544_vm15 = vmor %vm542_vm14, %vm543_vm13 }
 0x322   : > { %v539_v57 = vsub.f32 1.0, %v538_v55 }
 0x324   : > { %v540_v60 = vmul.f32 %v767_v54, %v539_v57 }
 0x326   : > { %v541_v62 = vadd.f32 %v767_v54, %v540_v60 }
 0x328   : > { %v545_v2 = vsel %vm544_vm15, %v767_v54, %v541_v62 }
 0x329   : > { %v550_v3 = vsel %vm547_vm0, %v549_v0, %v545_v2 }
 0x32a   : > { %v551_v4 = vmul.f32 %v550_v3, %v524_v1 }
 0x32c   : > { %552 = vst [vmem:[%s284_s17] sm:$0xff] %v551_v4 }
 0x32d   : > { %795 = shalt.err (!%p792_p5)
}
 0x32e   : > { %684 = dma.vmem_to_hbm [thread:$0]  (%p921_p4), %s568_s24, 128, %s570_s25, %s554_s21  }
 0x32f PF: > { %p690_p6 = scmp.ge.s32.totalorder %s846_s23, 2  ;;  %s581_s13 = sand.u32 1, %s826_s18  }
 0x330   : > { %s582_s11 = scalar_lea.sflag [#allocation6], %s581_s13 }
 0x331   : > { %p687_p7 = pnand %p690_p6, %p928_p8 }
 0x333   : > { %p688_p9 = pneg %p687_p7 }
 0x335   : > { %821 = dma.done.wait (%p688_p9), %s582_s11, 128  }
 0x336   : > { %823 = vsyncadd (%p688_p9), %s582_s11, 4294967168  ;;  %s18_s23 = sadd.s32 1, %s846_s23   ;;  %s1066_s18 = smov %s830_s19 }
 0x337   : > { %p15_p10 = scmp.ge.s32.totalorder %s18_s23, 4   ;;  %s1067_s19 = smov %s834_s20 }
 0x338   : > { %s1068_s20 = smov %s934_s6  ;;  %s1069_s21 = smov %s842_s22 }
 0x339   : > { %s1070_s22 = smov %s1072_s26  ;;  %17 = sbr.rel (!%p15_p10) target bundleno = 4 (0x4), region = 89 }
 0x33e   :  { %588 = vsyncpa [#allocation6], 1 }
 0x33f   :  { %590 = vsyncpa [#allocation6 + $0x1], 1 }

</bundles_post_ra>
